<compile_context>
chip_gen: v5e
topology: v5e:2x2
jax: 0.10.0
libtpu: 0.0.40
codegen_flags: <defaults>
</compile_context>

<pallas_src>
import functools

import jax
import jax.numpy as jnp
import numpy as np
from jax.experimental import pallas as pl
from jax.experimental.pallas import tpu as pltpu


def _round_up(a: int, b: int) -> int:
    return (a + b - 1) // b * b


def _embed_ln_kernel(x_ref, w_ref, b_ref, g_ref, beta_ref, o_ref, *, eps, d_valid):
    # x_ref: (TM, C)  w_ref: (C, Dp)  b/g/beta_ref: (1, Dp)  o_ref: (TM, Dp)
    # Dp is the lane-padded embed dim; only the first d_valid columns are real.
    x = x_ref[...].astype(jnp.float32)
    w = w_ref[...].astype(jnp.float32)

    # Linear: y = x @ W + b (MXU matmul, f32 accumulate). Padded weight/bias
    # columns are exactly zero, so padded columns of y are exactly zero.
    y = jnp.dot(x, w, preferred_element_type=jnp.float32)
    y = y + b_ref[...].astype(jnp.float32)

    d_total = y.shape[-1]
    if d_valid == d_total:
        # Common case: embed_dim already a multiple of 128.
        mean = jnp.mean(y, axis=-1, keepdims=True)
        centered = y - mean
        var = jnp.mean(centered * centered, axis=-1, keepdims=True)
    else:
        # Masked LayerNorm statistics over the first d_valid columns only.
        col = jax.lax.broadcasted_iota(jnp.int32, y.shape, dimension=1)
        valid = col < d_valid
        inv_d = 1.0 / float(d_valid)
        mean = jnp.sum(y, axis=-1, keepdims=True) * inv_d        # padded cols are 0
        centered = jnp.where(valid, y - mean, 0.0)
        var = jnp.sum(centered * centered, axis=-1, keepdims=True) * inv_d

    y_norm = centered * jax.lax.rsqrt(var + eps)
    out = y_norm * g_ref[...].astype(jnp.float32) + beta_ref[...].astype(jnp.float32)
    o_ref[...] = out.astype(o_ref.dtype)


def embedding_layer(x, weight, bias, gamma, beta, *, eps=1e-5, tile_m=512,
                    vmem_budget_bytes=24 * 1024 * 1024):
    """Fused Linear(in_chans -> embed_dim) + LayerNorm(embed_dim).

    x:      (..., in_chans)            (f32 or bf16 storage)
    weight: (in_chans, embed_dim)      (transposed vs torch's (out, in))
    bias, gamma, beta: (embed_dim,)
    returns (..., embed_dim) in x.dtype
    """
    orig_lead = x.shape[:-1]
    in_chans = x.shape[-1]
    d_valid = weight.shape[1]

    n_tokens = int(np.prod(orig_lead)) if orig_lead else 1
    xf = x.reshape(n_tokens, in_chans)

    # Lane-dense output width: pad only the (tiny) parameters, never x.
    d_total = _round_up(d_valid, 128)
    d_pad = d_total - d_valid
    if d_pad:
        weight = jnp.pad(weight, ((0, 0), (0, d_pad)))
        bias = jnp.pad(bias, (0, d_pad))
        gamma = jnp.pad(gamma, (0, d_pad))
        beta = jnp.pad(beta, (0, d_pad))

    bias2 = bias.reshape(1, d_total)
    gamma2 = gamma.reshape(1, d_total)
    beta2 = beta.reshape(1, d_total)

    # ---- token-tile selection ------------------------------------------------
    # (a) never larger than the (8-rounded) token count,
    # (b) >= 2 grid steps when there is enough work (v7x: 2 TCs shard "parallel"),
    # (c) capped so 2x-buffered x/out + 1x-buffered params fit a conservative
    #     VMEM budget (v7x has only 64 MiB physical VMEM, ~32 MiB scoped default).
    tokens_r8 = max(8, _round_up(n_tokens, 8))
    tile = max(8, _round_up(min(int(tile_m), tokens_r8), 8))
    if n_tokens >= 512 and pl.cdiv(n_tokens, tile) < 2:
        tile = _round_up(pl.cdiv(n_tokens, 2), 8)

    x_bytes = xf.dtype.itemsize
    out_bytes = x.dtype.itemsize
    w_bytes = weight.dtype.itemsize
    per_row = 2 * (in_chans * x_bytes + d_total * out_bytes)          # 2x-buffered x + out
    fixed = in_chans * d_total * w_bytes + 3 * d_total * 4            # 1x-buffered params
    max_rows = max(8, (vmem_budget_bytes - fixed) // max(per_row, 1))
    tile = max(8, min(tile, (max_rows // 8) * 8))

    grid = (pl.cdiv(n_tokens, tile),)

    vmem_limit = int(min(48 * 1024 * 1024,
                         max(fixed + per_row * tile + (4 << 20), 16 << 20)))

    cost = pl.CostEstimate(
        flops=2 * n_tokens * in_chans * d_valid + 8 * n_tokens * d_valid,
        transcendentals=n_tokens,  # one rsqrt per row
        bytes_accessed=(n_tokens * in_chans * x_bytes
                        + in_chans * d_total * w_bytes
                        + 3 * d_total * 4
                        + n_tokens * d_total * out_bytes),
    )

    # Grid-invariant operands: keep a single VMEM copy (no re-DMA, no 2nd buffer).
    invariant = pl.Buffered(buffer_count=1)

    out = pl.pallas_call(
        functools.partial(_embed_ln_kernel, eps=eps, d_valid=d_valid),
        out_shape=jax.ShapeDtypeStruct((n_tokens, d_total), x.dtype),
        grid_spec=pltpu.PrefetchScalarGridSpec(
            num_scalar_prefetch=0,
            grid=grid,
            in_specs=[
                pl.BlockSpec((tile, in_chans), lambda i: (i, 0)),            # x tile
                pl.BlockSpec((in_chans, d_total), lambda i: (0, 0),
                             pipeline_mode=invariant),                        # weight
                pl.BlockSpec((1, d_total), lambda i: (0, 0),
                             pipeline_mode=invariant),                        # bias
                pl.BlockSpec((1, d_total), lambda i: (0, 0),
                             pipeline_mode=invariant),                        # ln gamma
                pl.BlockSpec((1, d_total), lambda i: (0, 0),
                             pipeline_mode=invariant),                        # ln beta
            ],
            out_specs=pl.BlockSpec((tile, d_total), lambda i: (i, 0)),
        ),
        compiler_params=pltpu.CompilerParams(
            dimension_semantics=("parallel",),
            vmem_limit_bytes=vmem_limit,
        ),
        cost_estimate=cost,
    )(xf, weight, bias2, gamma2, beta2)

    if d_pad:
        out = out[:, :d_valid]
    return out.reshape(*orig_lead, d_valid)


def _reference(x, weight, bias, gamma, beta, eps=1e-5):
    y = jnp.einsum("...c,cd->...d",
                   x.astype(jnp.float32), weight.astype(jnp.float32)) + bias
    mean = jnp.mean(y, axis=-1, keepdims=True)
    var = jnp.mean((y - mean) ** 2, axis=-1, keepdims=True)
    return ((y - mean) * jax.lax.rsqrt(var + eps)) * gamma + beta


if __name__ == "__main__":
    in_chans = 19
    embed_dim = 128
    batch, seq = 2, 8

    key = jax.random.PRNGKey(0)
    kx, kw, kb, kg, kbe = jax.random.split(key, 5)

    # Deterministic synthetic parameters (nn.Linear(19,128) + LayerNorm(128)).
    x = jax.random.normal(kx, (batch, seq, in_chans), dtype=jnp.float32)
    weight = jax.random.normal(kw, (in_chans, embed_dim), dtype=jnp.float32) * 0.05
    bias = jax.random.normal(kb, (embed_dim,), dtype=jnp.float32) * 0.01
    gamma = 1.0 + 0.1 * jax.random.normal(kg, (embed_dim,), dtype=jnp.float32)
    beta = 0.1 * jax.random.normal(kbe, (embed_dim,), dtype=jnp.float32)

    out = jax.block_until_ready(embedding_layer(x, weight, bias, gamma, beta))
    ref = _reference(x, weight, bias, gamma, beta)
    np.testing.assert_allclose(np.asarray(out), np.asarray(ref), rtol=1e-5, atol=1e-5)
    assert out.shape == (batch, seq, embed_dim)

    # Ragged token count (21 tokens, tile=8 -> partial last block, no jnp.pad of x)
    # plus a non-128-multiple embed_dim (96 -> lane-padded params + masked LN).
    x2 = jax.random.normal(kx, (3, 7, in_chans), dtype=jnp.float32)
    w2 = jax.random.normal(kw, (in_chans, 96), dtype=jnp.float32) * 0.05
    b2 = jax.random.normal(kb, (96,), dtype=jnp.float32) * 0.01
    g2 = jnp.ones((96,), dtype=jnp.float32)
    be2 = jnp.zeros((96,), dtype=jnp.float32)
    out2 = jax.block_until_ready(embedding_layer(x2, w2, b2, g2, be2, tile_m=8))
    ref2 = _reference(x2, w2, b2, g2, be2)
    np.testing.assert_allclose(np.asarray(out2), np.asarray(ref2), rtol=1e-5, atol=1e-5)
    assert out2.shape == (3, 7, 96)

    # Larger token count: exercises the multi-step pipelined path (grid > 1).
    x3 = jax.random.normal(kx, (4, 300, in_chans), dtype=jnp.float32)
    out3 = jax.block_until_ready(embedding_layer(x3, weight, bias, gamma, beta))
    ref3 = _reference(x3, weight, bias, gamma, beta)
    np.testing.assert_allclose(np.asarray(out3), np.asarray(ref3), rtol=1e-5, atol=1e-5)

    # bf16 HBM storage path (upcast in-kernel; matmul/LN math stays f32).
    out_bf = jax.block_until_ready(
        embedding_layer(x.astype(jnp.bfloat16), weight.astype(jnp.bfloat16),
                        bias, gamma, beta))
    np.testing.assert_allclose(np.asarray(out_bf, dtype=np.float32), np.asarray(ref),
                               rtol=0, atol=0.15)

    print("KERNEL_OK")
</pallas_src>

<mosaic_0001>
module attributes {stable_mosaic.version = 11 : i64} {
  func.func @_embed_ln_kernel(%arg0: i32, %arg1: memref<16x19xf32, #tpu.memory_space<vmem>>, %arg2: memref<19x128xf32, #tpu.memory_space<vmem>>, %arg3: memref<1x128xf32, #tpu.memory_space<vmem>>, %arg4: memref<1x128xf32, #tpu.memory_space<vmem>>, %arg5: memref<1x128xf32, #tpu.memory_space<vmem>>, %arg6: memref<16x128xf32, #tpu.memory_space<vmem>>) attributes {dimension_semantics = [#tpu.dimension_semantics<parallel>], iteration_bounds = array<i64: 1>, scalar_prefetch = 0 : i64, scratch_operands = 0 : i64, tpu.core_type = #tpu.core_type<tc>, window_params = [{transform_indices = @transform_0, window_bounds = array<i64: 16, 19>}, {pipeline_mode = #tpu.pipeline_mode<synchronous>, transform_indices = @transform_1, window_bounds = array<i64: 19, 128>}, {pipeline_mode = #tpu.pipeline_mode<synchronous>, transform_indices = @transform_2, window_bounds = array<i64: 1, 128>}, {pipeline_mode = #tpu.pipeline_mode<synchronous>, transform_indices = @transform_3, window_bounds = array<i64: 1, 128>}, {pipeline_mode = #tpu.pipeline_mode<synchronous>, transform_indices = @transform_4, window_bounds = array<i64: 1, 128>}, {transform_indices = @transform_5, window_bounds = array<i64: 16, 128>}]} {
    %c0 = arith.constant 0 : index
    %c0_0 = arith.constant 0 : index
    %0 = vector.load %arg1[%c0, %c0_0] : memref<16x19xf32, #tpu.memory_space<vmem>>, vector<16x19xf32>
    %c0_1 = arith.constant 0 : index
    %c0_2 = arith.constant 0 : index
    %1 = vector.load %arg2[%c0_1, %c0_2] : memref<19x128xf32, #tpu.memory_space<vmem>>, vector<19x128xf32>
    %cst = arith.constant dense<0.000000e+00> : vector<16x128xf32>
    %2 = tpu.matmul %0, %1, %cst {dimension_numbers = #tpu.dot_dimension_numbers<[1], [0], [0], [1], [0, 0, 1, 1], [], []>} : vector<16x19xf32>, vector<19x128xf32>, vector<16x128xf32> -> vector<16x128xf32>
    %c0_3 = arith.constant 0 : index
    %c0_4 = arith.constant 0 : index
    %3 = vector.load %arg3[%c0_3, %c0_4] : memref<1x128xf32, #tpu.memory_space<vmem>>, vector<1x128xf32>
    %4 = vector.broadcast %3 : vector<1x128xf32> to vector<16x128xf32>
    %5 = arith.addf %2, %4 : vector<16x128xf32>
    %cst_5 = arith.constant dense<0.000000e+00> : vector<16xf32>
    %6 = vector.multi_reduction <add>, %5, %cst_5 [1] : vector<16x128xf32> to vector<16xf32>
    %7 = vector.shape_cast %6 : vector<16xf32> to vector<16x1xf32>
    %cst_6 = arith.constant 1.280000e+02 : f32
    %8 = vector.broadcast %cst_6 : f32 to vector<16x1xf32>
    %9 = arith.divf %7, %8 : vector<16x1xf32>
    %10 = vector.broadcast %9 : vector<16x1xf32> to vector<16x128xf32>
    %11 = arith.subf %5, %10 : vector<16x128xf32>
    %12 = arith.mulf %11, %11 : vector<16x128xf32>
    %cst_7 = arith.constant dense<0.000000e+00> : vector<16xf32>
    %13 = vector.multi_reduction <add>, %12, %cst_7 [1] : vector<16x128xf32> to vector<16xf32>
    %14 = vector.shape_cast %13 : vector<16xf32> to vector<16x1xf32>
    %cst_8 = arith.constant 1.280000e+02 : f32
    %15 = vector.broadcast %cst_8 : f32 to vector<16x1xf32>
    %16 = arith.divf %14, %15 : vector<16x1xf32>
    %cst_9 = arith.constant 9.99999974E-6 : f32
    %17 = vector.broadcast %cst_9 : f32 to vector<16x1xf32>
    %18 = arith.addf %16, %17 : vector<16x1xf32>
    %19 = math.rsqrt %18 : vector<16x1xf32>
    %20 = vector.broadcast %19 : vector<16x1xf32> to vector<16x128xf32>
    %21 = arith.mulf %11, %20 : vector<16x128xf32>
    %c0_10 = arith.constant 0 : index
    %c0_11 = arith.constant 0 : index
    %22 = vector.load %arg4[%c0_10, %c0_11] : memref<1x128xf32, #tpu.memory_space<vmem>>, vector<1x128xf32>
    %23 = vector.broadcast %22 : vector<1x128xf32> to vector<16x128xf32>
    %24 = arith.mulf %21, %23 : vector<16x128xf32>
    %c0_12 = arith.constant 0 : index
    %c0_13 = arith.constant 0 : index
    %25 = vector.load %arg5[%c0_12, %c0_13] : memref<1x128xf32, #tpu.memory_space<vmem>>, vector<1x128xf32>
    %26 = vector.broadcast %25 : vector<1x128xf32> to vector<16x128xf32>
    %27 = arith.addf %24, %26 : vector<16x128xf32>
    %c0_14 = arith.constant 0 : index
    %c0_15 = arith.constant 0 : index
    %28 = vector.load %arg6[%c0_14, %c0_15] : memref<16x128xf32, #tpu.memory_space<vmem>>, vector<16x128xf32>
    tpu.vector_store %arg6[%c0_14, %c0_15], %27 {strides = array<i32>} : memref<16x128xf32, #tpu.memory_space<vmem>>, vector<16x128xf32>,
    return
  }
  func.func @transform_0(%arg0: i32) -> (i32, i32) {
    %c0_i32 = arith.constant 0 : i32
    %c0_i32_0 = arith.constant 0 : i32
    return %arg0, %c0_i32 : i32, i32
  }
  func.func @transform_1(%arg0: i32) -> (i32, i32) {
    %c0_i32 = arith.constant 0 : i32
    %c0_i32_0 = arith.constant 0 : i32
    %c0_i32_1 = arith.constant 0 : i32
    return %c0_i32, %c0_i32_0 : i32, i32
  }
  func.func @transform_2(%arg0: i32) -> (i32, i32) {
    %c0_i32 = arith.constant 0 : i32
    %c0_i32_0 = arith.constant 0 : i32
    %c0_i32_1 = arith.constant 0 : i32
    return %c0_i32, %c0_i32_0 : i32, i32
  }
  func.func @transform_3(%arg0: i32) -> (i32, i32) {
    %c0_i32 = arith.constant 0 : i32
    %c0_i32_0 = arith.constant 0 : i32
    %c0_i32_1 = arith.constant 0 : i32
    return %c0_i32, %c0_i32_0 : i32, i32
  }
  func.func @transform_4(%arg0: i32) -> (i32, i32) {
    %c0_i32 = arith.constant 0 : i32
    %c0_i32_0 = arith.constant 0 : i32
    %c0_i32_1 = arith.constant 0 : i32
    return %c0_i32, %c0_i32_0 : i32, i32
  }
  func.func @transform_5(%arg0: i32) -> (i32, i32) {
    %c0_i32 = arith.constant 0 : i32
    %c0_i32_0 = arith.constant 0 : i32
    return %arg0, %c0_i32 : i32, i32
  }
}

</mosaic_0001>

<bundles_post_ra>
// kernel: tpu_custom_call.1
= control target key start
LH: loop header
LB: loop body
LE: loop exit
PB: predicated region body
PF: predicated region fallthrough
CT: control target
= control target key end

     0   :  { %10 = vsyncpa [#allocation3], 0  ;;  %s339_s0 = inlined_call_operand.hbm [shape: f32[16,19], index: 0, kind: input, shape index: {}]   ;;  %s340_s1 = inlined_call_operand.hbm [shape: f32[19,128], index: 1, kind: input, shape index: {}]   ;;  %s341_s2 = inlined_call_operand.vmem [shape: f32[1,128], index: 2, kind: input, shape index: {}]   ;;  %s342_s3 = inlined_call_operand.vmem [shape: f32[1,128], index: 3, kind: input, shape index: {}]   ;;  %s343_s4 = inlined_call_operand.vmem [shape: f32[1,128], index: 4, kind: input, shape index: {}]   ;;  %s344_s5 = inlined_call_operand.hbm [shape: f32[16,128], index: 5, kind: output, shape index: {}]  }
   0x1   :  { %11 = vsyncpa [#allocation6], 0 }
   0x2   :  { %12 = vsyncpa [#allocation4], 0  ;;  %s17_s20 = sshll.u32 %s339_s0, 4  ;;  %s276_s21 = smov [#allocation2]   ;;  %s18_s20 = int_to_ptr.hbm [resolvable:$true] %s17_s20 }
   0x3   :  { %s19_s22 = sshll.u32 %s276_s21, 4  ;;  %s30_s25 = sshll.u32 %s340_s1, 4  ;;  %s20_s22 = int_to_ptr.vmem [resolvable:$true] %s19_s22  ;;  %s31_s25 = int_to_ptr.hbm [resolvable:$true] %s30_s25 }
   0x4   :  { %s277_s26 = smov 128   ;;  %s278_s27 = smov 8  }
   0x5   :  { %25 = dma.hbm_to_vmem [thread:$0]  %s18_s20, 256, %s20_s22, [#allocation3], %s277_s26, %s277_s26, %s278_s27  }
   0x6   :  { %s279_s28 = smov [#allocation5]  }
   0x7   :  { %s32_s29 = sshll.u32 %s279_s28, 4  ;;  %s33_s29 = int_to_ptr.vmem [resolvable:$true] %s32_s29 }
   0x8   :  { %38 = dma.hbm_to_vmem [thread:$0]  %s31_s25, 384, %s33_s29, [#allocation6], %s277_s26, %s277_s26, %s278_s27  }
   0x9   :  { %270 = dma.done.wait [#allocation3], 256  }
   0xa   :  { %271 = vsyncadd [#allocation3], 4294967040 }
   0xb   :  { %272 = dma.done.wait [#allocation6], 384  }
   0xc   :  { %273 = vsyncadd [#allocation6], 4294966912  ;;  %vm69_vm0 = vcmask 1042432   ;;  %v57_v0 = vld [vmem:[#allocation5 + $0x10] sm:$0x7]  ;;  %v56_v1 = vld [vmem:[#allocation5 + $0x8] sm:$0xff] }
   0xd   :  { %177 = vmatpush.msk.msra.mxu0 %vm69_vm0, %v57_v0  ;;  %180 = vmatpush.msk.msra.mxu1 %vm69_vm0, %v57_v0  ;;  %v55_v2 = vld [vmem:[#allocation5] sm:$0xff]  ;;  %v53_v3 = vld [vmem:[#allocation2] sm:$0xff]  ;;  %vm62_vm1 = vcmask 154624   ;;  %v54_v4 = vld [vmem:[#allocation2 + $0x8] sm:$0xff]  ;;  %v280_v10 = vmov 128.0   ;;  %s281_s8 = smov [#allocation7]  }
   0xe   :  { %v189_v5 = vld [vmem:[%s341_s2] ss:$0 sm:$0xff]  ;;  %192 = vrcp.f32 %v280_v10  ;;  %s163_s11 = sshll.u32 %s344_s5, 4  ;;  %s164_s11 = int_to_ptr.hbm [resolvable:$true] %s163_s11 }
   0xf   :  { %87 = vmatpush.msra.mxu0 %v56_v1  ;;  %181 = vmatpush.msra.mxu1 %v56_v1  ;;  %v190_v39 = vld [vmem:[%s342_s3] ss:$0 sm:$0xff]  ;;  %s161_s3 = sshll.u32 %s281_s8, 4  ;;  %s162_s3 = int_to_ptr.vmem [resolvable:$true] %s161_s3 }
  0x10   :  { %v191_v43 = vld [vmem:[%s343_s4] ss:$0 sm:$0xff] }
  0x11   :  { %88 = vmatpush.msra.mxu0 %v55_v2  ;;  %182 = vmatpush.msra.mxu1 %v55_v2 }
  0x12   :  { %178 = vmatmul.msk.f32.vlgmr.msra.gmra.mxu0 %vm62_vm1, %v53_v3  ;;  %179 = vmatmul.msk.f32.vlgmr.msra.gmra.mxu1 %vm62_vm1, %v54_v4 }
  0x14   :  { %v193_v11 = vpop.eup %192 }
  0x15   :  { %v101_v12 = vmul.f32 128.0, %v193_v11  ;;  %vm105_vm2 = vweird.f32 %v193_v11 }
  0x17   :  { %v102_v13 = vsub.f32 1.0, %v101_v12 }
  0x19   :  { %v103_v14 = vmul.f32 %v193_v11, %v102_v13 }
  0x1b   :  { %v104_v15 = vadd.f32 %v193_v11, %v103_v14 }
  0x1d   :  { %v106_v16 = vsel %vm105_vm2, %v193_v11, %v104_v15 }
  0x8f   :  { %v90_v6 = vpop.f32.mrf.mxu0  ;;  %v93_v8 = vpop.f32.mrf.mxu1 }
  0x90   :  { %v91_v7 = vadd.f32 %v189_v5, %v90_v6  ;;  %v94_v9 = vadd.f32 %v189_v5, %v93_v8 }
  0x92   :  { %96 = vadd.xlane.f32.xlu0 %v91_v7 }
  0x9a   :  { %98 = vadd.xlane.f32.xlu0 %v94_v9 }
 0x105   :  { %v97_v17 = vpop.xlane.xlu0 %96 }
 0x106   :  { %v107_v18 = vmul.f32 %v106_v16, %v97_v17 }
 0x108   :  { %v109_v19 = vsub.f32 %v91_v7, %v107_v18 }
 0x10a   :  { %v111_v20 = vmul.f32 %v109_v19, %v109_v19 }
 0x10c   :  { %113 = vadd.xlane.f32.xlu1 %v111_v20 }
 0x10d   :  { %v99_v21 = vpop.xlane.xlu0 %98 }
 0x10e   :  { %v108_v22 = vmul.f32 %v106_v16, %v99_v21 }
 0x110   :  { %v110_v23 = vsub.f32 %v94_v9, %v108_v22 }
 0x112   :  { %v112_v24 = vmul.f32 %v110_v23, %v110_v23 }
 0x114   :  { %115 = vadd.xlane.f32.xlu1 %v112_v24 }
 0x17f   :  { %v114_v25 = vpop.xlane.xlu1 %113 }
 0x180   :  { %v117_v26 = vmul.f32 %v114_v25, %v106_v16 }
 0x182   :  { %v119_v27 = vadd.f32 1e-05, %v117_v26 }
 0x184   :  { %194 = vrsqrt.f32 %v119_v27  ;;  %vm127_vm4 = vweird.f32 %v119_v27 }
 0x187   :  { %v116_v28 = vpop.xlane.xlu1 %115 }
 0x188   :  { %v118_v29 = vmul.f32 %v116_v28, %v106_v16 }
 0x18a   :  { %v195_v30 = vpop.eup %194  ;;  %v120_v31 = vadd.f32 1e-05, %v118_v29 }
 0x18b   :  { %v122_v32 = vmul.f32 %v195_v30, %v119_v27  ;;  %vm128_vm3 = vweird.f32 %v195_v30 }
 0x18c   :  { %196 = vrsqrt.f32 %v120_v31  ;;  %vm129_vm5 = vmor %vm127_vm4, %vm128_vm3  ;;  %vm137_vm7 = vweird.f32 %v120_v31 }
 0x18d   :  { %v123_v33 = vmul.f32 %v195_v30, %v122_v32 }
 0x18f   :  { %v124_v34 = vmul.f32 0.5, %v123_v33 }
 0x191   :  { %v125_v35 = vsub.f32 1.5, %v124_v34 }
 0x192   :  { %v197_v36 = vpop.eup %196 }
 0x193   :  { %v126_v37 = vmul.f32 %v195_v30, %v125_v35  ;;  %v132_v38 = vmul.f32 %v197_v36, %v120_v31  ;;  %vm138_vm6 = vweird.f32 %v197_v36 }
 0x194   :  { %vm139_vm8 = vmor %vm137_vm7, %vm138_vm6 }
 0x195   :  { %v130_v40 = vsel %vm129_vm5, %v195_v30, %v126_v37  ;;  %v133_v41 = vmul.f32 %v197_v36, %v132_v38 }
 0x196   :  { %v141_v42 = vmul.f32 %v130_v40, %v109_v19 }
 0x197   :  { %v134_v44 = vmul.f32 0.5, %v133_v41 }
 0x198   :  { %v147_v45 = vmul.f32 %v190_v39, %v141_v42 }
 0x199   :  { %v135_v46 = vsub.f32 1.5, %v134_v44 }
 0x19a   :  { %v153_v47 = vadd.f32 %v191_v43, %v147_v45 }
 0x19b   :  { %v136_v48 = vmul.f32 %v197_v36, %v135_v46 }
 0x19c   :  { %155 = vst [vmem:[#allocation7] sm:$0xff] %v153_v47 }
 0x19d   :  { %v140_v49 = vsel %vm139_vm8, %v197_v36, %v136_v48 }
 0x19e   :  { %v142_v50 = vmul.f32 %v140_v49, %v110_v23 }
 0x1a0   :  { %v148_v51 = vmul.f32 %v190_v39, %v142_v50 }
 0x1a2   :  { %v154_v52 = vadd.f32 %v191_v43, %v148_v51 }
 0x1a4   :  { %156 = vst [vmem:[#allocation7 + $0x8] sm:$0xff] %v154_v52 }
 0x1a5   :  { %169 = dma.vmem_to_hbm [thread:$0]  %s162_s3, 256, %s164_s11, [#allocation4], %s277_s26, %s277_s26, %s278_s27  }
 0x1a6   :  { %274 = dma.done.wait [#allocation4], 256  }
 0x1a7   :  { %275 = vsyncadd [#allocation4], 4294967040 }
 0x1a8   :  { %174 = vsyncpa [#allocation3], 1 }
 0x1a9   :  { %175 = vsyncpa [#allocation6], 1 }
 0x1aa   :  { %176 = vsyncpa [#allocation4], 1 }

</bundles_post_ra>
